<compile_context>
chip_gen: v7x
topology: tpu7x:2x2x1
jax: 0.10.0
libtpu: 0.0.40
codegen_flags: <defaults>
</compile_context>

<pallas_src>
import numpy as np
import jax
import jax.numpy as jnp
from jax.experimental import pallas as pl
from jax.experimental.pallas import tpu as pltpu


def _round_up(x, m):
    return ((x + m - 1) // m) * m


def _cdiv(a, b):
    return -(-a // b)


def _make_mlp_kernel(num_layers):
    """Kernel for a fixed number of fused linear layers."""
    def kernel(x_ref, *refs):
        w_refs = refs[0:2 * num_layers:2]
        b_refs = refs[1:2 * num_layers:2]
        out_ref = refs[2 * num_layers]

        h = x_ref[...]                      # native compute dtype (no upcast)
        for w_ref, b_ref in zip(w_refs, b_refs):
            acc = jnp.dot(h, w_ref[...], preferred_element_type=jnp.float32)
            acc = acc + b_ref[...]          # bias kept in f32
            h = acc.astype(w_ref.dtype)     # back to MXU-native dtype between layers
        out_ref[...] = h.astype(out_ref.dtype)

    return kernel


def prepare_params(weights, biases, compute_dtype=None):
    """One-time layout prep (hoisted out of the per-call forward).

    weights: list of (out_i, in_i) arrays (PyTorch nn.Linear layout)
    biases:  list of (out_i,) arrays
    Returns (w_prep, b_prep, d_out):
      - weights transposed to (in, out), cast to compute_dtype, feature dims
        zero-padded to multiples of 128 (exact math, lane-dense stores)
      - biases as f32 (1, out_padded)
    """
    num_layers = len(weights)
    assert num_layers == len(biases) and num_layers >= 1

    w_prep, b_prep = [], []
    prev_out_p = None
    for i, (w, b) in enumerate(zip(weights, biases)):
        out_ch, in_ch = w.shape
        in_p = in_ch if i == 0 else prev_out_p      # chain padded widths
        out_p = _round_up(out_ch, 128)

        wt = jnp.asarray(w).T                       # (in, out)
        if compute_dtype is not None:
            wt = wt.astype(compute_dtype)
        wt = jnp.pad(wt, ((0, in_p - in_ch), (0, out_p - out_ch)))

        bp = jnp.pad(jnp.asarray(b, jnp.float32), (0, out_p - out_ch))
        b_prep.append(bp.reshape(1, -1))
        w_prep.append(wt)
        prev_out_p = out_p

    return w_prep, b_prep, int(weights[-1].shape[0])


def _mlp_forward_padded(x2, w_prep, b_prep, *, tile_m, single_buffer_weights):
    M, d_in = x2.shape
    d_out_p = w_prep[-1].shape[1]
    dtype = x2.dtype
    itemsize = jnp.dtype(dtype).itemsize
    num_layers = len(w_prep)

    # --- VMEM budgeting -----------------------------------------------------
    w_bytes = sum(int(np.prod(w.shape)) * w.dtype.itemsize for w in w_prep)
    b_bytes = sum(int(np.prod(b.shape)) * b.dtype.itemsize for b in b_prep)
    if not single_buffer_weights:
        w_bytes *= 2
        b_bytes *= 2

    max_width = max([d_in] + [w.shape[1] for w in w_prep])
    # double-buffered x tile + double-buffered out tile + f32 intermediate
    per_row = 2 * d_in * itemsize + 2 * d_out_p * itemsize + 2 * max_width * 4

    budget = 44 * 1024 * 1024   # fits v7x's 64 MiB/TC with headroom; fine on v5e/v6e
    tm_cap = max(8, ((budget - w_bytes - b_bytes) // per_row) // 8 * 8)

    tm = min(tile_m, _round_up(M, 8), tm_cap)
    if M >= 16:
        # v7x: keep >=2 grid steps so the "parallel" axis shards across both TCs.
        tm = min(tm, _round_up(_cdiv(M, 2), 8))
    grid_m = _cdiv(M, tm)

    vmem_bytes = w_bytes + b_bytes + tm * per_row + (2 << 20)
    vmem_limit = int(min(max(vmem_bytes, 32 << 20), 128 << 20))

    # --- specs ----------------------------------------------------------------
    def const_map(i):
        return (0, 0)

    in_specs = [pl.BlockSpec((tm, d_in), lambda i: (i, 0))]
    args = [x2]
    for w, b in zip(w_prep, b_prep):
        if single_buffer_weights:
            # Constant index_map -> fetched once; single buffer halves residency.
            w_spec = pl.BlockSpec(w.shape, const_map, pipeline_mode=pl.Buffered(1))
            b_spec = pl.BlockSpec(b.shape, const_map, pipeline_mode=pl.Buffered(1))
        else:
            w_spec = pl.BlockSpec(w.shape, const_map)
            b_spec = pl.BlockSpec(b.shape, const_map)
        in_specs += [w_spec, b_spec]
        args += [w, b]

    return pl.pallas_call(
        _make_mlp_kernel(num_layers),
        grid=(grid_m,),
        in_specs=in_specs,
        out_specs=pl.BlockSpec((tm, d_out_p), lambda i: (i, 0)),
        out_shape=jax.ShapeDtypeStruct((M, d_out_p), dtype),
        compiler_params=pltpu.CompilerParams(
            dimension_semantics=("parallel",),
            vmem_limit_bytes=vmem_limit),
    )(*args)


def mlp_forward(x, params, *, tile_m=512):
    """Fused MLP forward. `params` comes from prepare_params (called once)."""
    w_prep, b_prep, d_out = params
    lead_shape = x.shape[:-1]
    d_in = x.shape[-1]
    M = int(np.prod(lead_shape)) if lead_shape else 1

    compute_dtype = w_prep[0].dtype
    x2 = x.reshape(M, d_in)
    if x2.dtype != compute_dtype:
        x2 = x2.astype(compute_dtype)

    try:
        out = _mlp_forward_padded(x2, w_prep, b_prep, tile_m=tile_m,
                                  single_buffer_weights=True)
    except Exception:
        # Fallback for JAX builds that reject pipeline_mode=pl.Buffered(1).
        out = _mlp_forward_padded(x2, w_prep, b_prep, tile_m=tile_m,
                                  single_buffer_weights=False)

    out = out[:, :d_out]                    # drop the 128-lane feature padding
    return out.reshape(*lead_shape, d_out)


def _reference(x, weights, biases):
    """Pure-JAX reference matching the PyTorch module exactly."""
    h = x
    for w, b in zip(weights, biases):
        h = h @ w.T + b
    return h


if __name__ == "__main__":
    key = jax.random.PRNGKey(0)
    B, S = 2, 8
    in_channels = (32, 64)
    out_channels = (64, 16)

    keys = jax.random.split(key, 1 + 2 * len(in_channels))
    x = jax.random.normal(keys[0], (B, S, in_channels[0]), dtype=jnp.float32)

    weights, biases = [], []
    for i, (ic, oc) in enumerate(zip(in_channels, out_channels)):
        bound = 1.0 / np.sqrt(ic)
        w = jax.random.uniform(keys[1 + 2 * i], (oc, ic), jnp.float32,
                               minval=-bound, maxval=bound)
        b = jax.random.uniform(keys[2 + 2 * i], (oc,), jnp.float32,
                               minval=-bound, maxval=bound)
        weights.append(w)
        biases.append(b)

    # One-time parameter prep (transpose + 128-lane padding + dtype cast).
    params = prepare_params(weights, biases, compute_dtype=jnp.float32)

    out = mlp_forward(x, params)
    out = jax.block_until_ready(out)

    ref = _reference(x, weights, biases)
    assert out.shape == (B, S, out_channels[-1])
    assert jnp.allclose(out, ref, atol=1e-5, rtol=1e-5)

    print("KERNEL_OK")
</pallas_src>

<mosaic_0001>
module attributes {stable_mosaic.version = 11 : i64} {
  func.func @kernel(%arg0: i32, %arg1: memref<8x32xf32, #tpu.memory_space<vmem>>, %arg2: memref<32x128xf32, #tpu.memory_space<vmem>>, %arg3: memref<1x128xf32, #tpu.memory_space<vmem>>, %arg4: memref<128x128xf32, #tpu.memory_space<vmem>>, %arg5: memref<1x128xf32, #tpu.memory_space<vmem>>, %arg6: memref<8x128xf32, #tpu.memory_space<vmem>>) attributes {dimension_semantics = [#tpu.dimension_semantics<parallel>], iteration_bounds = array<i64: 2>, scalar_prefetch = 0 : i64, scratch_operands = 0 : i64, tpu.core_type = #tpu.core_type<tc>, window_params = [{transform_indices = @transform_0, window_bounds = array<i64: 8, 32>}, {pipeline_mode = #tpu.pipeline_mode<synchronous>, transform_indices = @transform_1, window_bounds = array<i64: 32, 128>}, {pipeline_mode = #tpu.pipeline_mode<synchronous>, transform_indices = @transform_2, window_bounds = array<i64: 1, 128>}, {pipeline_mode = #tpu.pipeline_mode<synchronous>, transform_indices = @transform_3, window_bounds = array<i64: 128, 128>}, {pipeline_mode = #tpu.pipeline_mode<synchronous>, transform_indices = @transform_4, window_bounds = array<i64: 1, 128>}, {transform_indices = @transform_5, window_bounds = array<i64: 8, 128>}]} {
    %c0 = arith.constant 0 : index
    %c0_0 = arith.constant 0 : index
    %0 = vector.load %arg1[%c0, %c0_0] : memref<8x32xf32, #tpu.memory_space<vmem>>, vector<8x32xf32>
    %c0_1 = arith.constant 0 : index
    %c0_2 = arith.constant 0 : index
    %1 = vector.load %arg2[%c0_1, %c0_2] : memref<32x128xf32, #tpu.memory_space<vmem>>, vector<32x128xf32>
    %cst = arith.constant dense<0.000000e+00> : vector<8x128xf32>
    %2 = tpu.matmul %0, %1, %cst {dimension_numbers = #tpu.dot_dimension_numbers<[1], [0], [0], [1], [0, 0, 1, 1], [], []>} : vector<8x32xf32>, vector<32x128xf32>, vector<8x128xf32> -> vector<8x128xf32>
    %c0_3 = arith.constant 0 : index
    %c0_4 = arith.constant 0 : index
    %3 = vector.load %arg3[%c0_3, %c0_4] : memref<1x128xf32, #tpu.memory_space<vmem>>, vector<1x128xf32>
    %4 = vector.broadcast %3 : vector<1x128xf32> to vector<8x128xf32>
    %5 = arith.addf %2, %4 : vector<8x128xf32>
    %c0_5 = arith.constant 0 : index
    %c0_6 = arith.constant 0 : index
    %6 = vector.load %arg4[%c0_5, %c0_6] : memref<128x128xf32, #tpu.memory_space<vmem>>, vector<128x128xf32>
    %cst_7 = arith.constant dense<0.000000e+00> : vector<8x128xf32>
    %7 = tpu.matmul %5, %6, %cst_7 {dimension_numbers = #tpu.dot_dimension_numbers<[1], [0], [0], [1], [0, 0, 1, 1], [], []>} : vector<8x128xf32>, vector<128x128xf32>, vector<8x128xf32> -> vector<8x128xf32>
    %c0_8 = arith.constant 0 : index
    %c0_9 = arith.constant 0 : index
    %8 = vector.load %arg5[%c0_8, %c0_9] : memref<1x128xf32, #tpu.memory_space<vmem>>, vector<1x128xf32>
    %9 = vector.broadcast %8 : vector<1x128xf32> to vector<8x128xf32>
    %10 = arith.addf %7, %9 : vector<8x128xf32>
    %c0_10 = arith.constant 0 : index
    %c0_11 = arith.constant 0 : index
    %11 = vector.load %arg6[%c0_10, %c0_11] : memref<8x128xf32, #tpu.memory_space<vmem>>, vector<8x128xf32>
    tpu.vector_store %arg6[%c0_10, %c0_11], %10 {strides = array<i32>} : memref<8x128xf32, #tpu.memory_space<vmem>>, vector<8x128xf32>,
    return
  }
  func.func @transform_0(%arg0: i32) -> (i32, i32) {
    %c0_i32 = arith.constant 0 : i32
    %c0_i32_0 = arith.constant 0 : i32
    return %arg0, %c0_i32 : i32, i32
  }
  func.func @transform_1(%arg0: i32) -> (i32, i32) {
    %c0_i32 = arith.constant 0 : i32
    %c0_i32_0 = arith.constant 0 : i32
    %c0_i32_1 = arith.constant 0 : i32
    return %c0_i32, %c0_i32_0 : i32, i32
  }
  func.func @transform_2(%arg0: i32) -> (i32, i32) {
    %c0_i32 = arith.constant 0 : i32
    %c0_i32_0 = arith.constant 0 : i32
    %c0_i32_1 = arith.constant 0 : i32
    return %c0_i32, %c0_i32_0 : i32, i32
  }
  func.func @transform_3(%arg0: i32) -> (i32, i32) {
    %c0_i32 = arith.constant 0 : i32
    %c0_i32_0 = arith.constant 0 : i32
    %c0_i32_1 = arith.constant 0 : i32
    return %c0_i32, %c0_i32_0 : i32, i32
  }
  func.func @transform_4(%arg0: i32) -> (i32, i32) {
    %c0_i32 = arith.constant 0 : i32
    %c0_i32_0 = arith.constant 0 : i32
    %c0_i32_1 = arith.constant 0 : i32
    return %c0_i32, %c0_i32_0 : i32, i32
  }
  func.func @transform_5(%arg0: i32) -> (i32, i32) {
    %c0_i32 = arith.constant 0 : i32
    %c0_i32_0 = arith.constant 0 : i32
    return %arg0, %c0_i32 : i32, i32
  }
}

module attributes {stable_mosaic.version = 11 : i64} {
  func.func @kernel(%arg0: i32, %arg1: memref<8x32xf32, #tpu.memory_space<vmem>>, %arg2: memref<32x128xf32, #tpu.memory_space<vmem>>, %arg3: memref<1x128xf32, #tpu.memory_space<vmem>>, %arg4: memref<128x128xf32, #tpu.memory_space<vmem>>, %arg5: memref<1x128xf32, #tpu.memory_space<vmem>>, %arg6: memref<8x128xf32, #tpu.memory_space<vmem>>) attributes {dimension_semantics = [#tpu.dimension_semantics<parallel>], iteration_bounds = array<i64: 2>, scalar_prefetch = 0 : i64, scratch_operands = 0 : i64, tpu.core_type = #tpu.core_type<tc>, window_params = [{transform_indices = @transform_0, window_bounds = array<i64: 8, 32>}, {pipeline_mode = #tpu.pipeline_mode<synchronous>, transform_indices = @transform_1, window_bounds = array<i64: 32, 128>}, {pipeline_mode = #tpu.pipeline_mode<synchronous>, transform_indices = @transform_2, window_bounds = array<i64: 1, 128>}, {pipeline_mode = #tpu.pipeline_mode<synchronous>, transform_indices = @transform_3, window_bounds = array<i64: 128, 128>}, {pipeline_mode = #tpu.pipeline_mode<synchronous>, transform_indices = @transform_4, window_bounds = array<i64: 1, 128>}, {transform_indices = @transform_5, window_bounds = array<i64: 8, 128>}]} {
    %c0 = arith.constant 0 : index
    %c0_0 = arith.constant 0 : index
    %0 = vector.load %arg1[%c0, %c0_0] : memref<8x32xf32, #tpu.memory_space<vmem>>, vector<8x32xf32>
    %c0_1 = arith.constant 0 : index
    %c0_2 = arith.constant 0 : index
    %1 = vector.load %arg2[%c0_1, %c0_2] : memref<32x128xf32, #tpu.memory_space<vmem>>, vector<32x128xf32>
    %cst = arith.constant dense<0.000000e+00> : vector<8x128xf32>
    %2 = tpu.matmul %0, %1, %cst {dimension_numbers = #tpu.dot_dimension_numbers<[1], [0], [0], [1], [0, 0, 1, 1], [], []>} : vector<8x32xf32>, vector<32x128xf32>, vector<8x128xf32> -> vector<8x128xf32>
    %c0_3 = arith.constant 0 : index
    %c0_4 = arith.constant 0 : index
    %3 = vector.load %arg3[%c0_3, %c0_4] : memref<1x128xf32, #tpu.memory_space<vmem>>, vector<1x128xf32>
    %4 = vector.broadcast %3 : vector<1x128xf32> to vector<8x128xf32>
    %5 = arith.addf %2, %4 : vector<8x128xf32>
    %c0_5 = arith.constant 0 : index
    %c0_6 = arith.constant 0 : index
    %6 = vector.load %arg4[%c0_5, %c0_6] : memref<128x128xf32, #tpu.memory_space<vmem>>, vector<128x128xf32>
    %cst_7 = arith.constant dense<0.000000e+00> : vector<8x128xf32>
    %7 = tpu.matmul %5, %6, %cst_7 {dimension_numbers = #tpu.dot_dimension_numbers<[1], [0], [0], [1], [0, 0, 1, 1], [], []>} : vector<8x128xf32>, vector<128x128xf32>, vector<8x128xf32> -> vector<8x128xf32>
    %c0_8 = arith.constant 0 : index
    %c0_9 = arith.constant 0 : index
    %8 = vector.load %arg5[%c0_8, %c0_9] : memref<1x128xf32, #tpu.memory_space<vmem>>, vector<1x128xf32>
    %9 = vector.broadcast %8 : vector<1x128xf32> to vector<8x128xf32>
    %10 = arith.addf %7, %9 : vector<8x128xf32>
    %c0_10 = arith.constant 0 : index
    %c0_11 = arith.constant 0 : index
    %11 = vector.load %arg6[%c0_10, %c0_11] : memref<8x128xf32, #tpu.memory_space<vmem>>, vector<8x128xf32>
    tpu.vector_store %arg6[%c0_10, %c0_11], %10 {strides = array<i32>} : memref<8x128xf32, #tpu.memory_space<vmem>>, vector<8x128xf32>,
    return
  }
  func.func @transform_0(%arg0: i32) -> (i32, i32) {
    %c0_i32 = arith.constant 0 : i32
    %c0_i32_0 = arith.constant 0 : i32
    return %arg0, %c0_i32 : i32, i32
  }
  func.func @transform_1(%arg0: i32) -> (i32, i32) {
    %c0_i32 = arith.constant 0 : i32
    %c0_i32_0 = arith.constant 0 : i32
    %c0_i32_1 = arith.constant 0 : i32
    return %c0_i32, %c0_i32_0 : i32, i32
  }
  func.func @transform_2(%arg0: i32) -> (i32, i32) {
    %c0_i32 = arith.constant 0 : i32
    %c0_i32_0 = arith.constant 0 : i32
    %c0_i32_1 = arith.constant 0 : i32
    return %c0_i32, %c0_i32_0 : i32, i32
  }
  func.func @transform_3(%arg0: i32) -> (i32, i32) {
    %c0_i32 = arith.constant 0 : i32
    %c0_i32_0 = arith.constant 0 : i32
    %c0_i32_1 = arith.constant 0 : i32
    return %c0_i32, %c0_i32_0 : i32, i32
  }
  func.func @transform_4(%arg0: i32) -> (i32, i32) {
    %c0_i32 = arith.constant 0 : i32
    %c0_i32_0 = arith.constant 0 : i32
    %c0_i32_1 = arith.constant 0 : i32
    return %c0_i32, %c0_i32_0 : i32, i32
  }
  func.func @transform_5(%arg0: i32) -> (i32, i32) {
    %c0_i32 = arith.constant 0 : i32
    %c0_i32_0 = arith.constant 0 : i32
    return %arg0, %c0_i32 : i32, i32
  }
}

</mosaic_0001>

<bundles_post_ra>
// kernel: tpu_custom_call.1
= control target key start
LH: loop header
LB: loop body
LE: loop exit
PB: predicated region body
PF: predicated region fallthrough
CT: control target
= control target key end

     0   :  { %10 = vsyncpa [#allocation3], 0  ;;  %s1180_s0 = inlined_call_operand.hbm [shape: f32[16,32], index: 0, kind: input, shape index: {}]   ;;  %s1181_s1 = inlined_call_operand.hbm [shape: f32[32,128], index: 1, kind: input, shape index: {}]   ;;  %s1182_s2 = inlined_call_operand.vmem [shape: f32[1,128], index: 2, kind: input, shape index: {}]   ;;  %s1183_s3 = inlined_call_operand.hbm [shape: f32[128,128], index: 3, kind: input, shape index: {}]   ;;  %s1184_s4 = inlined_call_operand.vmem [shape: f32[1,128], index: 4, kind: input, shape index: {}]   ;;  %s1185_s5 = inlined_call_operand.hbm [shape: f32[16,128], index: 5, kind: output, shape index: {}]  }
   0x1   :  { %12 = vsyncpa [#allocation3 + $0x1], 0 }
   0x2   :  { %13 = vsyncpa [#allocation6], 0 }
   0x3   :  { %14 = vsyncpa [#allocation4], 0 }
   0x4   :  { %16 = vsyncpa [#allocation4 + $0x1], 0  ;;  %s938_s18 = smov 0   ;;  %s940_s19 = smov 0  }
   0x5   :  { %s942_s20 = smov 0   ;;  %s944_s21 = smov 0  }
   0x6 LB: > { %s959_s22 = sadd.s32 4294967295, %s897_s21   ;;  %s552_s23 = sadd.s32 4294967294, %s897_s21   ;;  %s897_s21 = sphi %s944_s21, %s1205_s21   ;;  %s893_s20 = sphi %s942_s20, %s1204_s20   ;;  %s889_s19 = sphi %s940_s19, %s1203_s19   ;;  %s885_s18 = sphi %s938_s18, %s1202_s18  }
   0x7   : > { %p42_p0 = scmp.ne.s32.totalorder %s889_s19, %s885_s18  ;;  %p1186_p1 = scmp.eq.s32.totalorder %s959_s22, 0 }
   0x8   : > { %p156_p3 = scmp.eq.s32.totalorder %s552_s23, 1  ;;  %p553_p5 = scmp.ge.s32.totalorder %s897_s21, 1 }
   0x9   : > { %p968_p4 = por %p1186_p1, %p42_p0  ;;  %p163_p7 = scmp.lt.s32.totalorder %s897_s21, 3 }
   0xa   : > { %p973_p6 = por %p156_p3, %p42_p0  ;;  %s899_s27 = smov [#allocation5]  }
   0xb   : > { %s1189_s24 = scalar_select %p968_p4, 1, 0 }
   0xc   : > { %s1190_s25 = scalar_select %p973_p6, 1, 0 }
   0xd   : > { %p978_p8 = pnand %p553_p5, %p163_p7  ;;  %s175_s28 = sshll.u32 %s899_s27, 4  ;;  %s982_s28 = int_to_ptr.vmem [resolvable:$true] %s175_s28 }
   0xe   : > { %s900_s30 = smov [#allocation7]   ;;  %s741_s9 = scalar_lea.hbm %s1181_s1, 512 }
   0xf   : > { %p681_p9 = pneg %p978_p8  ;;  %s191_s6 = sshll.u32 %s900_s30, 4  ;;  %s993_s6 = int_to_ptr.vmem [resolvable:$true] %s191_s6 }
  0x10   : > { %p742_p12 = scmp.ne.s32.totalorder %s1181_s1, %s741_s9  ;;  %p748_p5 = scmp.lt.u32.totalorder %s741_s9, %s1181_s1 }
  0x11   : > { %p989_p11 = pnand %p681_p9, %p1186_p1 }
  0x13   : > { %p743_p13 = pneg %p989_p11 }
  0x15   : > { %p744_p0 = pnand %p743_p13, %p742_p12 }
  0x17   : > { %p745_p3 = pneg %p744_p0 }
  0x19   : > { %p750_p7 = pnand %p748_p5, %p745_p3 }
  0x1b   : > { %753 = shalt.err (!%p750_p7)
}
  0x1c   : > { %s754_s14 = scalar_lea.vmem %s982_s28, 512  ;;  %p762_p2 = scmp.lt.s32.totalorder %s982_s28, %s982_s28 }
  0x1d   : > { %p755_p9 = scmp.ne.s32.totalorder %s982_s28, %s754_s14  ;;  %p763_p12 = scmp.lt.s32.totalorder %s754_s14, %s754_s14 }
  0x1f   : > { %p757_p10 = pnand %p755_p9, %p743_p13  ;;  %p764_p0 = por %p763_p12, %p762_p2 }
  0x21   : > { %p758_p1 = pneg %p757_p10 }
  0x23   : > { %p765_p6 = pnand %p764_p0, %p758_p1 }
  0x25   : > { %768 = shalt.err (!%p765_p6)
}
  0x26   : > { %s901_s15 = smov 128   ;;  %s902_s16 = smov 8  }
  0x27   : > { %684 = dma.hbm_to_vmem [thread:$0]  (!%p989_p11), %s1181_s1, 512, %s982_s28, [#allocation6], %s901_s15, %s901_s15, %s902_s16  }
  0x28   : > { %s769_s7 = scalar_lea.hbm %s1183_s3, 2048 }
  0x29   : > { %p770_p2 = scmp.ne.s32.totalorder %s1183_s3, %s769_s7  ;;  %p776_p10 = scmp.lt.u32.totalorder %s769_s7, %s1183_s3 }
  0x2b   : > { %p772_p1 = pnand %p770_p2, %p743_p13 }
  0x2d   : > { %p773_p6 = pneg %p772_p1 }
  0x2f   : > { %p778_p3 = pnand %p776_p10, %p773_p6 }
  0x31   : > { %781 = shalt.err (!%p778_p3)
}
  0x32   : > { %s782_s28 = scalar_lea.vmem %s993_s6, 2048  ;;  %p790_p12 = scmp.lt.s32.totalorder %s993_s6, %s993_s6 }
  0x33   : > { %p783_p5 = scmp.ne.s32.totalorder %s993_s6, %s782_s28  ;;  %p791_p0 = scmp.lt.s32.totalorder %s782_s28, %s782_s28 }
  0x35   : > { %p785_p7 = pnand %p783_p5, %p743_p13  ;;  %p792_p2 = por %p791_p0, %p790_p12 }
  0x37   : > { %p786_p9 = pneg %p785_p7 }
  0x39   : > { %p793_p1 = pnand %p792_p2, %p786_p9 }
  0x3b   : > { %796 = shalt.err (!%p793_p1)
}
  0x3c   : > { %687 = dma.hbm_to_vmem [thread:$0]  (!%p989_p11), %s1183_s3, 2048, %s993_s6, [#allocation6], %s901_s15, %s901_s15, %s902_s16  }
  0x3d   : > { %s1048_s14 = sadd.s32 1, %s897_s21   ;;  %s29_s29 = sadd.s32 1, %s893_s20 }
  0x3e   : > { %s26_s17 = ssub.s32 %s897_s21, %s1048_s14  ;;  %p36_p13 = scmp.ne.s32.totalorder %s893_s20, %s889_s19 }
  0x3f   : > { %p27_p6 = scmp.eq.s32.totalorder %s26_s17, 0  ;;  %p37_p10 = scmp.eq.s32.totalorder %s897_s21, 0 }
  0x40   : > { %p1193_p3 = scmp.eq.s32.totalorder %s959_s22, 1  ;;  %p698_p7 = scmp.lt.s32.totalorder %s897_s21, 2 }
  0x41   : > { %s1064_s27 = scalar_select %p27_p6, %s893_s20, %s29_s29  }
  0x42   : > { %p1058_p5 = por %p1193_p3, %p36_p13  ;;  %p38_p9 = por %p37_p10, %p36_p13 }
  0x43   : > { %s208_s30 = sand.u32 1, %s893_s20   ;;  %s558_s6 = sshll.u32 %s897_s21, 7 }
  0x44   : > { %s1194_s23 = scalar_select %p1058_p5, 1, 0 }
  0x45   : > { %s557_s7 = sshll.u32 %s208_s30, 3  ;;  %s1071_s8 = scalar_lea.hbm %s1180_s0, %s558_s6 }
  0x46   : > { %s212_s9 = scalar_lea.vmem [#allocation2], %s557_s7  ;;  %p1075_p11 = pnand %p698_p7, %p38_p9 }
  0x47   : > { %s219_s10 = sshll.u32 %s212_s9, 4  ;;  %s209_s28 = scalar_lea.sflag [#allocation3], %s208_s30  ;;  %s1073_s10 = int_to_ptr.vmem [resolvable:$true] %s219_s10 }
  0x48   : > { %s797_s12 = scalar_lea.hbm %s1071_s8, 128  ;;  %p799_p0 = pneg %p1075_p11 }
  0x49   : > { %p798_p12 = scmp.ne.s32.totalorder %s1071_s8, %s797_s12  ;;  %s802_s17 = scalar_lea.hbm %s1180_s0, 256 }
  0x4a   : > { %p803_p13 = scmp.lt.u32.totalorder %s1071_s8, %s1180_s0  ;;  %p804_p6 = scmp.lt.u32.totalorder %s802_s17, %s797_s12 }
  0x4b   : > { %p800_p2 = pnand %p799_p0, %p798_p12  ;;  %p806_p3 = scmp.lt.u32.totalorder %s797_s12, %s1071_s8 }
  0x4c   : > { %p805_p10 = por %p804_p6, %p803_p13 }
  0x4d   : > { %p801_p1 = pneg %p800_p2 }
  0x4e   : > { %p807_p7 = por %p806_p3, %p805_p10 }
  0x50   : > { %p808_p9 = pnand %p807_p7, %p801_p1 }
  0x52   : > { %811 = shalt.err (!%p808_p9)
}
  0x53   : > { %s812_s30 = scalar_lea.vmem %s1073_s10, 128  ;;  %s903_s15 = smov [#allocation2]  }
  0x54   : > { %p813_p12 = scmp.ne.s32.totalorder %s1073_s10, %s812_s30  ;;  %s817_s16 = sshll.u32 %s903_s15, 4  ;;  %s818_s16 = int_to_ptr.vmem [resolvable:$false] %s817_s16 }
  0x55   : > { %s819_s9 = scalar_lea.vmem %s818_s16, 256  ;;  %p820_p4 = scmp.lt.s32.totalorder %s1073_s10, %s818_s16 }
  0x56   : > { %p815_p2 = pnand %p813_p12, %p799_p0  ;;  %p821_p13 = scmp.lt.s32.totalorder %s819_s9, %s812_s30 }
  0x58   : > { %p816_p5 = pneg %p815_p2  ;;  %p822_p6 = por %p821_p13, %p820_p4 }
  0x5a   : > { %p823_p10 = pnand %p822_p6, %p816_p5 }
  0x5c   : > { %826 = shalt.err (!%p823_p10)
}
  0x5d   : > { %691 = dma.hbm_to_vmem [thread:$0]  (!%p1075_p11), %s1071_s8, 128, %s1073_s10, %s209_s28  }
  0x5e   : > { %228 = sbr.rel (%p978_p8) target bundleno = 557 (0x22d), region = 40  ;;  %s1107_s12 = sand.u32 (!%p978_p8), 1, %s889_s19  }
  0x5f   : > { %s560_s13 = sshll.u32 (!%p978_p8), %s1107_s12, 3  ;;  %s231_s29 = scalar_lea.sflag (!%p978_p8), [#allocation3], %s1107_s12 }
  0x60   : > { %s1113_s17 = scalar_lea.vmem (!%p978_p8), [#allocation2], %s560_s13  ;;  %p1196_p4 = scmp.ne.s32.totalorder (!%p978_p8), %s1189_s24, 0 }
  0x65   : > { %872 = dma.done.wait (%p1196_p4), %s231_s29, 128  }
  0x66   : > { %874 = vsyncadd (%p1196_p4), %s231_s29, 4294967168  ;;  %p1197_p5 = scmp.eq.s32.totalorder %s959_s22, 0 }
  0x68   : > { %876 = dma.done.wait (%p1197_p5), [#allocation6], 2560   ;;  %p1198_p8 = pmov %p1197_p5 }
  0x69   : > { %v904_v0 = vmov 0.0|0.0   ;;  %vm905_vm0 = vmmov 0   ;;  %v906_v1 = vmov 0.0   ;;  %v270_v2 = vld [vmem:[#allocation5] sm:$0xff]  ;;  %v271_v3 = vld [vmem:[#allocation5 + $0x8] sm:$0xff]  ;;  %v272_v4 = vld [vmem:[#allocation5 + $0x10] sm:$0xff] }
  0x6a   : > { %878 = vsyncadd (%p1198_p8), [#allocation6], 4294964736  ;;  %639 = vmatprep.subr.bf16.mxu0 %v904_v0  ;;  %601 = vmatprep.mubr.msk.f32.mxu0 %vm905_vm0, %v906_v1  ;;  %v640_v5 = vpack.c.bf16 %v271_v3, %v270_v2  ;;  %v273_v6 = vld [vmem:[#allocation5 + $0x18] sm:$0xff]  ;;  %v355_v7 = vld [vmem:[#allocation7] sm:$0xff]  ;;  %vm281_vm1 = vcmask 261120   ;;  %s568_s11 = sshll.u32 %s959_s22, 7 }
  0x6b   : > { %645 = vmatprep.subr.bf16.mxu1 %v904_v0  ;;  %636 = vmatprep.mubr.msk.f32.mxu1 %vm905_vm0, %v906_v1  ;;  %v356_v8 = vld [vmem:[#allocation7 + $0x8] sm:$0xff]  ;;  %v357_v9 = vld [vmem:[#allocation7 + $0x10] sm:$0xff]  ;;  %v358_v10 = vld [vmem:[#allocation7 + $0x18] sm:$0xff]  ;;  %v643_v11 = vpack.c.bf16 %v273_v6, %v272_v4  ;;  %s268_s28 = scalar_lea.vmem [#allocation8], %s560_s13  ;;  %s1136_s15 = scalar_lea.hbm %s1185_s5, %s568_s11 }
  0x6c   : > { %641 = vmatpush3.bf16.msra.mxu0 %v640_v5  ;;  %v646_v12 = vpack.c.bf16 %v356_v8, %v355_v7  ;;  %v649_v13 = vpack.c.bf16 %v358_v10, %v357_v9  ;;  %v359_v14 = vld [vmem:[#allocation7 + $0x20] sm:$0xff]  ;;  %v360_v15 = vld [vmem:[#allocation7 + $0x28] sm:$0xff]  ;;  %v269_v16 = vld [vmem:[%s1113_s17] sm:$0xff]  ;;  %s463_s7 = sshll.u32 %s268_s28, 4  ;;  %s450_s16 = scalar_lea.sflag [#allocation4], %s1107_s12  ;;  %s1138_s7 = int_to_ptr.vmem [resolvable:$true] %s463_s7 }
  0x6d   : > { %642 = vmatprep.subr.bf16.mxu0 %v904_v0  ;;  %v652_v17 = vpack.c.bf16 %v360_v15, %v359_v14  ;;  %v361_v18 = vld [vmem:[#allocation7 + $0x30] sm:$0xff]  ;;  %v362_v19 = vld [vmem:[#allocation7 + $0x38] sm:$0xff]  ;;  %v363_v21 = vld [vmem:[#allocation7 + $0x40] sm:$0xff]  ;;  %s827_s9 = scalar_lea.vmem %s1138_s7, 128  ;;  %p1199_p0 = scmp.ne.s32.totalorder %s1194_s23, 0 }
  0x6e   : > { %647 = vmatpush3.bf16.msra.mxu1 %v646_v12  ;;  %v655_v20 = vpack.c.bf16 %v362_v19, %v361_v18  ;;  %v364_v22 = vld [vmem:[#allocation7 + $0x48] sm:$0xff]  ;;  %v365_v24 = vld [vmem:[#allocation7 + $0x50] sm:$0xff]  ;;  %v366_v25 = vld [vmem:[#allocation7 + $0x58] sm:$0xff]  ;;  %p828_p11 = scmp.ne.s32.totalorder %s1138_s7, %s827_s9  ;;  %s907_s22 = smov [#allocation8]  }
  0x6f   : > { %648 = vmatprep.subr.bf16.mxu1 %v904_v0  ;;  %v658_v23 = vpack.c.bf16 %v364_v22, %v363_v21  ;;  %v661_v26 = vpack.c.bf16 %v366_v25, %v365_v24  ;;  %v367_v27 = vld [vmem:[#allocation7 + $0x60] sm:$0xff]  ;;  %v368_v28 = vld [vmem:[#allocation7 + $0x68] sm:$0xff]  ;;  %v369_v30 = vld [vmem:[#allocation7 + $0x70] sm:$0xff]  ;;  %s831_s13 = sshll.u32 %s907_s22, 4  ;;  %s832_s13 = int_to_ptr.vmem [resolvable:$false] %s831_s13 }
  0x70   : > { %644 = vmatpush3.bf16.msra.mxu0 %v643_v11  ;;  %v664_v29 = vpack.c.bf16 %v368_v28, %v367_v27  ;;  %v370_v31 = vld [vmem:[#allocation7 + $0x78] sm:$0xff]  ;;  %v564_v33 = vld [vmem:[%s1182_s2] ss:$0 sm:$0xff]  ;;  %p829_p1 = pnand %p828_p11, %p1199_p0  ;;  %s833_s29 = scalar_lea.vmem %s832_s13, 256 }
  0x71   : > { %v667_v32 = vpack.c.bf16 %v370_v31, %v369_v30  ;;  %v566_v37 = vld [vmem:[%s1184_s4] ss:$0 sm:$0xff]  ;;  %p834_p7 = scmp.lt.s32.totalorder %s1138_s7, %s832_s13  ;;  %p835_p9 = scmp.lt.s32.totalorder %s833_s29, %s827_s9 }
  0x72   : > { %650 = vmatpush3.bf16.msra.mxu1 %v649_v13  ;;  %p830_p3 = pneg %p829_p1 }
  0x73   : > { %602 = vmatmul.mubr.msk.f32.vlgmr.msra.gmra.mrb[0].mxu0 %vm281_vm1, %v269_v16  ;;  %651 = vmatprep.subr.bf16.mxu1 %v904_v0  ;;  %p836_p12 = por %p835_p9, %p834_p7 }
  0x75   : > { %p837_p2 = pnand %p836_p12, %p830_p3 }
  0x76   : > { %653 = vmatpush3.bf16.msra.mxu1 %v652_v17 }
  0x77   : > { %654 = vmatprep.subr.bf16.mxu1 %v904_v0 }
  0x7a   : > { %656 = vmatpush3.bf16.msra.mxu1 %v655_v20 }
  0x7b   : > { %657 = vmatprep.subr.bf16.mxu1 %v904_v0 }
  0x7e   : > { %659 = vmatpush3.bf16.msra.mxu1 %v658_v23 }
  0x7f   : > { %660 = vmatprep.subr.bf16.mxu1 %v904_v0 }
  0x82   : > { %662 = vmatpush3.bf16.msra.mxu1 %v661_v26 }
  0x83   : > { %663 = vmatprep.subr.bf16.mxu1 %v904_v0 }
  0x86   : > { %665 = vmatpush3.bf16.msra.mxu1 %v664_v29 }
  0x87   : > { %666 = vmatprep.subr.bf16.mxu1 %v904_v0 }
  0x8a   : > { %668 = vmatpush3.bf16.msra.mxu1 %v667_v32 }
 0x146   : > { %v351_v34 = vpop.f32.mrb[0].mxu0 }
 0x147   : > { %v352_v35 = vadd.f32 %v564_v33, %v351_v34  ;;  %v603_v36 = vpop.f32.mrb[1].mxu0 }
 0x149   : > { %637 = vmatmul.mubr.f32.vlgmr.msra.gmra.mrb[0].mxu1 %v352_v35 }
 0x21c   : > { %v444_v38 = vpop.f32.mrb[0].mxu1 }
 0x21d   : > { %v445_v39 = vadd.f32 %v566_v37, %v444_v38  ;;  %v638_v40 = vpop.f32.mrb[1].mxu1 }
 0x21f   : > { %448 = vst [vmem:[%s268_s28] sm:$0xff] %v445_v39 }
 0x220   : > { %840 = shalt.err (!%p837_p2)
}
 0x221   : > { %s841_s12 = scalar_lea.hbm %s1136_s15, 128  ;;  %s845_s26 = scalar_lea.hbm %s1185_s5, 256 }
 0x222   : > { %p842_p13 = scmp.ne.s32.totalorder %s1136_s15, %s841_s12  ;;  %p846_p4 = scmp.lt.u32.totalorder %s1136_s15, %s1185_s5 }
 0x223   : > { %p847_p5 = scmp.lt.u32.totalorder %s845_s26, %s841_s12  ;;  %p849_p11 = scmp.lt.u32.totalorder %s841_s12, %s1136_s15 }
 0x224   : > { %p843_p6 = pnand %p842_p13, %p1199_p0 }
 0x225   : > { %p848_p8 = por %p847_p5, %p846_p4 }
 0x226   : > { %p844_p10 = pneg %p843_p6 }
 0x227   : > { %p850_p1 = por %p849_p11, %p848_p8 }
 0x229   : > { %p851_p3 = pnand %p850_p1, %p844_p10 }
 0x22b   : > { %854 = shalt.err (!%p851_p3)
}
 0x22c   : > { %679 = dma.vmem_to_hbm [thread:$0]  (%p1199_p0), %s1138_s7, 128, %s1136_s15, %s450_s16  }
 0x22d PF: > { %s475_s11 = sand.u32 1, %s885_s18   ;;  %p1200_p7 = scmp.ne.s32.totalorder %s1190_s25, 0 }
 0x22e   : > { %p1201_p9 = scmp.ge.s32.totalorder %s897_s21, 2  ;;  %s476_s28 = scalar_lea.sflag [#allocation4], %s475_s11 }
 0x230   : > { %p693_p12 = pnand %p1201_p9, %p1200_p7 }
 0x232   : > { %880 = dma.done.wait (!%p693_p12), %s476_s28, 128  }
 0x233   : > { %882 = vsyncadd (!%p693_p12), %s476_s28, 4294967168  ;;  %p19_p2 = scmp.ge.s32.totalorder %s1048_s14, 4   ;;  %s1202_s18 = smov %s889_s19 }
 0x234   : > { %s1203_s19 = smov %s893_s20  ;;  %s1204_s20 = smov %s1064_s27 }
 0x235   : > { %s1205_s21 = smov %s1048_s14  ;;  %21 = sbr.rel (!%p19_p2) target bundleno = 6 (0x6), region = 93 }
 0x23c   :  { %481 = vsyncpa [#allocation3], 1 }
 0x23d   :  { %483 = vsyncpa [#allocation3 + $0x1], 1 }
 0x23e   :  { %484 = vsyncpa [#allocation6], 1 }
 0x23f   :  { %485 = vsyncpa [#allocation4], 1 }
 0x240   :  { %487 = vsyncpa [#allocation4 + $0x1], 1 }

// kernel: tpu_custom_call.1
= control target key start
LH: loop header
LB: loop body
LE: loop exit
PB: predicated region body
PF: predicated region fallthrough
CT: control target
= control target key end

     0   :  { %10 = vsyncpa [#allocation3], 0  ;;  %s1180_s0 = inlined_call_operand.hbm [shape: f32[16,32], index: 0, kind: input, shape index: {}]   ;;  %s1181_s1 = inlined_call_operand.hbm [shape: f32[32,128], index: 1, kind: input, shape index: {}]   ;;  %s1182_s2 = inlined_call_operand.vmem [shape: f32[1,128], index: 2, kind: input, shape index: {}]   ;;  %s1183_s3 = inlined_call_operand.hbm [shape: f32[128,128], index: 3, kind: input, shape index: {}]   ;;  %s1184_s4 = inlined_call_operand.vmem [shape: f32[1,128], index: 4, kind: input, shape index: {}]   ;;  %s1185_s5 = inlined_call_operand.hbm [shape: f32[16,128], index: 5, kind: output, shape index: {}]  }
   0x1   :  { %12 = vsyncpa [#allocation3 + $0x1], 0 }
   0x2   :  { %13 = vsyncpa [#allocation6], 0 }
   0x3   :  { %14 = vsyncpa [#allocation4], 0 }
   0x4   :  { %16 = vsyncpa [#allocation4 + $0x1], 0  ;;  %s938_s18 = smov 0   ;;  %s940_s19 = smov 0  }
   0x5   :  { %s942_s20 = smov 0   ;;  %s944_s21 = smov 0  }
   0x6 LB: > { %s959_s22 = sadd.s32 4294967295, %s897_s21   ;;  %s552_s23 = sadd.s32 4294967294, %s897_s21   ;;  %s897_s21 = sphi %s944_s21, %s1205_s21   ;;  %s893_s20 = sphi %s942_s20, %s1204_s20   ;;  %s889_s19 = sphi %s940_s19, %s1203_s19   ;;  %s885_s18 = sphi %s938_s18, %s1202_s18  }
   0x7   : > { %p42_p0 = scmp.ne.s32.totalorder %s889_s19, %s885_s18  ;;  %p1186_p1 = scmp.eq.s32.totalorder %s959_s22, 0 }
   0x8   : > { %p156_p3 = scmp.eq.s32.totalorder %s552_s23, 1  ;;  %p553_p5 = scmp.ge.s32.totalorder %s897_s21, 1 }
   0x9   : > { %p968_p4 = por %p1186_p1, %p42_p0  ;;  %p163_p7 = scmp.lt.s32.totalorder %s897_s21, 3 }
   0xa   : > { %p973_p6 = por %p156_p3, %p42_p0  ;;  %s899_s27 = smov [#allocation5]  }
   0xb   : > { %s1189_s24 = scalar_select %p968_p4, 1, 0 }
   0xc   : > { %s1190_s25 = scalar_select %p973_p6, 1, 0 }
   0xd   : > { %p978_p8 = pnand %p553_p5, %p163_p7  ;;  %s175_s28 = sshll.u32 %s899_s27, 4  ;;  %s982_s28 = int_to_ptr.vmem [resolvable:$true] %s175_s28 }
   0xe   : > { %s900_s30 = smov [#allocation7]   ;;  %s741_s9 = scalar_lea.hbm %s1181_s1, 512 }
   0xf   : > { %p681_p9 = pneg %p978_p8  ;;  %s191_s6 = sshll.u32 %s900_s30, 4  ;;  %s993_s6 = int_to_ptr.vmem [resolvable:$true] %s191_s6 }
  0x10   : > { %p742_p12 = scmp.ne.s32.totalorder %s1181_s1, %s741_s9  ;;  %p748_p5 = scmp.lt.u32.totalorder %s741_s9, %s1181_s1 }
  0x11   : > { %p989_p11 = pnand %p681_p9, %p1186_p1 }
  0x13   : > { %p743_p13 = pneg %p989_p11 }
  0x15   : > { %p744_p0 = pnand %p743_p13, %p742_p12 }
  0x17   : > { %p745_p3 = pneg %p744_p0 }
  0x19   : > { %p750_p7 = pnand %p748_p5, %p745_p3 }
  0x1b   : > { %753 = shalt.err (!%p750_p7)
}
  0x1c   : > { %s754_s14 = scalar_lea.vmem %s982_s28, 512  ;;  %p762_p2 = scmp.lt.s32.totalorder %s982_s28, %s982_s28 }
  0x1d   : > { %p755_p9 = scmp.ne.s32.totalorder %s982_s28, %s754_s14  ;;  %p763_p12 = scmp.lt.s32.totalorder %s754_s14, %s754_s14 }
  0x1f   : > { %p757_p10 = pnand %p755_p9, %p743_p13  ;;  %p764_p0 = por %p763_p12, %p762_p2 }
  0x21   : > { %p758_p1 = pneg %p757_p10 }
  0x23   : > { %p765_p6 = pnand %p764_p0, %p758_p1 }
  0x25   : > { %768 = shalt.err (!%p765_p6)
}
  0x26   : > { %s901_s15 = smov 128   ;;  %s902_s16 = smov 8  }
  0x27   : > { %684 = dma.hbm_to_vmem [thread:$0]  (!%p989_p11), %s1181_s1, 512, %s982_s28, [#allocation6], %s901_s15, %s901_s15, %s902_s16  }
  0x28   : > { %s769_s7 = scalar_lea.hbm %s1183_s3, 2048 }
  0x29   : > { %p770_p2 = scmp.ne.s32.totalorder %s1183_s3, %s769_s7  ;;  %p776_p10 = scmp.lt.u32.totalorder %s769_s7, %s1183_s3 }
  0x2b   : > { %p772_p1 = pnand %p770_p2, %p743_p13 }
  0x2d   : > { %p773_p6 = pneg %p772_p1 }
  0x2f   : > { %p778_p3 = pnand %p776_p10, %p773_p6 }
  0x31   : > { %781 = shalt.err (!%p778_p3)
}
  0x32   : > { %s782_s28 = scalar_lea.vmem %s993_s6, 2048  ;;  %p790_p12 = scmp.lt.s32.totalorder %s993_s6, %s993_s6 }
  0x33   : > { %p783_p5 = scmp.ne.s32.totalorder %s993_s6, %s782_s28  ;;  %p791_p0 = scmp.lt.s32.totalorder %s782_s28, %s782_s28 }
  0x35   : > { %p785_p7 = pnand %p783_p5, %p743_p13  ;;  %p792_p2 = por %p791_p0, %p790_p12 }
  0x37   : > { %p786_p9 = pneg %p785_p7 }
  0x39   : > { %p793_p1 = pnand %p792_p2, %p786_p9 }
  0x3b   : > { %796 = shalt.err (!%p793_p1)
}
  0x3c   : > { %687 = dma.hbm_to_vmem [thread:$0]  (!%p989_p11), %s1183_s3, 2048, %s993_s6, [#allocation6], %s901_s15, %s901_s15, %s902_s16  }
  0x3d   : > { %s1048_s14 = sadd.s32 1, %s897_s21   ;;  %s29_s29 = sadd.s32 1, %s893_s20 }
  0x3e   : > { %s26_s17 = ssub.s32 %s897_s21, %s1048_s14  ;;  %p36_p13 = scmp.ne.s32.totalorder %s893_s20, %s889_s19 }
  0x3f   : > { %p27_p6 = scmp.eq.s32.totalorder %s26_s17, 0  ;;  %p37_p10 = scmp.eq.s32.totalorder %s897_s21, 0 }
  0x40   : > { %p1193_p3 = scmp.eq.s32.totalorder %s959_s22, 1  ;;  %p698_p7 = scmp.lt.s32.totalorder %s897_s21, 2 }
  0x41   : > { %s1064_s27 = scalar_select %p27_p6, %s893_s20, %s29_s29  }
  0x42   : > { %p1058_p5 = por %p1193_p3, %p36_p13  ;;  %p38_p9 = por %p37_p10, %p36_p13 }
  0x43   : > { %s208_s30 = sand.u32 1, %s893_s20   ;;  %s558_s6 = sshll.u32 %s897_s21, 7 }
  0x44   : > { %s1194_s23 = scalar_select %p1058_p5, 1, 0 }
  0x45   : > { %s557_s7 = sshll.u32 %s208_s30, 3  ;;  %s1071_s8 = scalar_lea.hbm %s1180_s0, %s558_s6 }
  0x46   : > { %s212_s9 = scalar_lea.vmem [#allocation2], %s557_s7  ;;  %p1075_p11 = pnand %p698_p7, %p38_p9 }
  0x47   : > { %s219_s10 = sshll.u32 %s212_s9, 4  ;;  %s209_s28 = scalar_lea.sflag [#allocation3], %s208_s30  ;;  %s1073_s10 = int_to_ptr.vmem [resolvable:$true] %s219_s10 }
  0x48   : > { %s797_s12 = scalar_lea.hbm %s1071_s8, 128  ;;  %p799_p0 = pneg %p1075_p11 }
  0x49   : > { %p798_p12 = scmp.ne.s32.totalorder %s1071_s8, %s797_s12  ;;  %s802_s17 = scalar_lea.hbm %s1180_s0, 256 }
  0x4a   : > { %p803_p13 = scmp.lt.u32.totalorder %s1071_s8, %s1180_s0  ;;  %p804_p6 = scmp.lt.u32.totalorder %s802_s17, %s797_s12 }
  0x4b   : > { %p800_p2 = pnand %p799_p0, %p798_p12  ;;  %p806_p3 = scmp.lt.u32.totalorder %s797_s12, %s1071_s8 }
  0x4c   : > { %p805_p10 = por %p804_p6, %p803_p13 }
  0x4d   : > { %p801_p1 = pneg %p800_p2 }
  0x4e   : > { %p807_p7 = por %p806_p3, %p805_p10 }
  0x50   : > { %p808_p9 = pnand %p807_p7, %p801_p1 }
  0x52   : > { %811 = shalt.err (!%p808_p9)
}
  0x53   : > { %s812_s30 = scalar_lea.vmem %s1073_s10, 128  ;;  %s903_s15 = smov [#allocation2]  }
  0x54   : > { %p813_p12 = scmp.ne.s32.totalorder %s1073_s10, %s812_s30  ;;  %s817_s16 = sshll.u32 %s903_s15, 4  ;;  %s818_s16 = int_to_ptr.vmem [resolvable:$false] %s817_s16 }
  0x55   : > { %s819_s9 = scalar_lea.vmem %s818_s16, 256  ;;  %p820_p4 = scmp.lt.s32.totalorder %s1073_s10, %s818_s16 }
  0x56   : > { %p815_p2 = pnand %p813_p12, %p799_p0  ;;  %p821_p13 = scmp.lt.s32.totalorder %s819_s9, %s812_s30 }
  0x58   : > { %p816_p5 = pneg %p815_p2  ;;  %p822_p6 = por %p821_p13, %p820_p4 }
  0x5a   : > { %p823_p10 = pnand %p822_p6, %p816_p5 }
  0x5c   : > { %826 = shalt.err (!%p823_p10)
}
  0x5d   : > { %691 = dma.hbm_to_vmem [thread:$0]  (!%p1075_p11), %s1071_s8, 128, %s1073_s10, %s209_s28  }
  0x5e   : > { %228 = sbr.rel (%p978_p8) target bundleno = 557 (0x22d), region = 40  ;;  %s1107_s12 = sand.u32 (!%p978_p8), 1, %s889_s19  }
  0x5f   : > { %s560_s13 = sshll.u32 (!%p978_p8), %s1107_s12, 3  ;;  %s231_s29 = scalar_lea.sflag (!%p978_p8), [#allocation3], %s1107_s12 }
  0x60   : > { %s1113_s17 = scalar_lea.vmem (!%p978_p8), [#allocation2], %s560_s13  ;;  %p1196_p4 = scmp.ne.s32.totalorder (!%p978_p8), %s1189_s24, 0 }
  0x65   : > { %872 = dma.done.wait (%p1196_p4), %s231_s29, 128  }
  0x66   : > { %874 = vsyncadd (%p1196_p4), %s231_s29, 4294967168  ;;  %p1197_p5 = scmp.eq.s32.totalorder %s959_s22, 0 }
  0x68   : > { %876 = dma.done.wait (%p1197_p5), [#allocation6], 2560   ;;  %p1198_p8 = pmov %p1197_p5 }
  0x69   : > { %v904_v0 = vmov 0.0|0.0   ;;  %vm905_vm0 = vmmov 0   ;;  %v906_v1 = vmov 0.0   ;;  %v270_v2 = vld [vmem:[#allocation5] sm:$0xff]  ;;  %v271_v3 = vld [vmem:[#allocation5 + $0x8] sm:$0xff]  ;;  %v272_v4 = vld [vmem:[#allocation5 + $0x10] sm:$0xff] }
  0x6a   : > { %878 = vsyncadd (%p1198_p8), [#allocation6], 4294964736  ;;  %639 = vmatprep.subr.bf16.mxu0 %v904_v0  ;;  %601 = vmatprep.mubr.msk.f32.mxu0 %vm905_vm0, %v906_v1  ;;  %v640_v5 = vpack.c.bf16 %v271_v3, %v270_v2  ;;  %v273_v6 = vld [vmem:[#allocation5 + $0x18] sm:$0xff]  ;;  %v355_v7 = vld [vmem:[#allocation7] sm:$0xff]  ;;  %vm281_vm1 = vcmask 261120   ;;  %s568_s11 = sshll.u32 %s959_s22, 7 }
  0x6b   : > { %645 = vmatprep.subr.bf16.mxu1 %v904_v0  ;;  %636 = vmatprep.mubr.msk.f32.mxu1 %vm905_vm0, %v906_v1  ;;  %v356_v8 = vld [vmem:[#allocation7 + $0x8] sm:$0xff]  ;;  %v357_v9 = vld [vmem:[#allocation7 + $0x10] sm:$0xff]  ;;  %v358_v10 = vld [vmem:[#allocation7 + $0x18] sm:$0xff]  ;;  %v643_v11 = vpack.c.bf16 %v273_v6, %v272_v4  ;;  %s268_s28 = scalar_lea.vmem [#allocation8], %s560_s13  ;;  %s1136_s15 = scalar_lea.hbm %s1185_s5, %s568_s11 }
  0x6c   : > { %641 = vmatpush3.bf16.msra.mxu0 %v640_v5  ;;  %v646_v12 = vpack.c.bf16 %v356_v8, %v355_v7  ;;  %v649_v13 = vpack.c.bf16 %v358_v10, %v357_v9  ;;  %v359_v14 = vld [vmem:[#allocation7 + $0x20] sm:$0xff]  ;;  %v360_v15 = vld [vmem:[#allocation7 + $0x28] sm:$0xff]  ;;  %v269_v16 = vld [vmem:[%s1113_s17] sm:$0xff]  ;;  %s463_s7 = sshll.u32 %s268_s28, 4  ;;  %s450_s16 = scalar_lea.sflag [#allocation4], %s1107_s12  ;;  %s1138_s7 = int_to_ptr.vmem [resolvable:$true] %s463_s7 }
  0x6d   : > { %642 = vmatprep.subr.bf16.mxu0 %v904_v0  ;;  %v652_v17 = vpack.c.bf16 %v360_v15, %v359_v14  ;;  %v361_v18 = vld [vmem:[#allocation7 + $0x30] sm:$0xff]  ;;  %v362_v19 = vld [vmem:[#allocation7 + $0x38] sm:$0xff]  ;;  %v363_v21 = vld [vmem:[#allocation7 + $0x40] sm:$0xff]  ;;  %s827_s9 = scalar_lea.vmem %s1138_s7, 128  ;;  %p1199_p0 = scmp.ne.s32.totalorder %s1194_s23, 0 }
  0x6e   : > { %647 = vmatpush3.bf16.msra.mxu1 %v646_v12  ;;  %v655_v20 = vpack.c.bf16 %v362_v19, %v361_v18  ;;  %v364_v22 = vld [vmem:[#allocation7 + $0x48] sm:$0xff]  ;;  %v365_v24 = vld [vmem:[#allocation7 + $0x50] sm:$0xff]  ;;  %v366_v25 = vld [vmem:[#allocation7 + $0x58] sm:$0xff]  ;;  %p828_p11 = scmp.ne.s32.totalorder %s1138_s7, %s827_s9  ;;  %s907_s22 = smov [#allocation8]  }
  0x6f   : > { %648 = vmatprep.subr.bf16.mxu1 %v904_v0  ;;  %v658_v23 = vpack.c.bf16 %v364_v22, %v363_v21  ;;  %v661_v26 = vpack.c.bf16 %v366_v25, %v365_v24  ;;  %v367_v27 = vld [vmem:[#allocation7 + $0x60] sm:$0xff]  ;;  %v368_v28 = vld [vmem:[#allocation7 + $0x68] sm:$0xff]  ;;  %v369_v30 = vld [vmem:[#allocation7 + $0x70] sm:$0xff]  ;;  %s831_s13 = sshll.u32 %s907_s22, 4  ;;  %s832_s13 = int_to_ptr.vmem [resolvable:$false] %s831_s13 }
  0x70   : > { %644 = vmatpush3.bf16.msra.mxu0 %v643_v11  ;;  %v664_v29 = vpack.c.bf16 %v368_v28, %v367_v27  ;;  %v370_v31 = vld [vmem:[#allocation7 + $0x78] sm:$0xff]  ;;  %v564_v33 = vld [vmem:[%s1182_s2] ss:$0 sm:$0xff]  ;;  %p829_p1 = pnand %p828_p11, %p1199_p0  ;;  %s833_s29 = scalar_lea.vmem %s832_s13, 256 }
  0x71   : > { %v667_v32 = vpack.c.bf16 %v370_v31, %v369_v30  ;;  %v566_v37 = vld [vmem:[%s1184_s4] ss:$0 sm:$0xff]  ;;  %p834_p7 = scmp.lt.s32.totalorder %s1138_s7, %s832_s13  ;;  %p835_p9 = scmp.lt.s32.totalorder %s833_s29, %s827_s9 }
  0x72   : > { %650 = vmatpush3.bf16.msra.mxu1 %v649_v13  ;;  %p830_p3 = pneg %p829_p1 }
  0x73   : > { %602 = vmatmul.mubr.msk.f32.vlgmr.msra.gmra.mrb[0].mxu0 %vm281_vm1, %v269_v16  ;;  %651 = vmatprep.subr.bf16.mxu1 %v904_v0  ;;  %p836_p12 = por %p835_p9, %p834_p7 }
  0x75   : > { %p837_p2 = pnand %p836_p12, %p830_p3 }
  0x76   : > { %653 = vmatpush3.bf16.msra.mxu1 %v652_v17 }
  0x77   : > { %654 = vmatprep.subr.bf16.mxu1 %v904_v0 }
  0x7a   : > { %656 = vmatpush3.bf16.msra.mxu1 %v655_v20 }
  0x7b   : > { %657 = vmatprep.subr.bf16.mxu1 %v904_v0 }
  0x7e   : > { %659 = vmatpush3.bf16.msra.mxu1 %v658_v23 }
  0x7f   : > { %660 = vmatprep.subr.bf16.mxu1 %v904_v0 }
  0x82   : > { %662 = vmatpush3.bf16.msra.mxu1 %v661_v26 }
  0x83   : > { %663 = vmatprep.subr.bf16.mxu1 %v904_v0 }
  0x86   : > { %665 = vmatpush3.bf16.msra.mxu1 %v664_v29 }
  0x87   : > { %666 = vmatprep.subr.bf16.mxu1 %v904_v0 }
  0x8a   : > { %668 = vmatpush3.bf16.msra.mxu1 %v667_v32 }
 0x146   : > { %v351_v34 = vpop.f32.mrb[0].mxu0 }
 0x147   : > { %v352_v35 = vadd.f32 %v564_v33, %v351_v34  ;;  %v603_v36 = vpop.f32.mrb[1].mxu0 }
 0x149   : > { %637 = vmatmul.mubr.f32.vlgmr.msra.gmra.mrb[0].mxu1 %v352_v35 }
 0x21c   : > { %v444_v38 = vpop.f32.mrb[0].mxu1 }
 0x21d   : > { %v445_v39 = vadd.f32 %v566_v37, %v444_v38  ;;  %v638_v40 = vpop.f32.mrb[1].mxu1 }
 0x21f   : > { %448 = vst [vmem:[%s268_s28] sm:$0xff] %v445_v39 }
 0x220   : > { %840 = shalt.err (!%p837_p2)
}
 0x221   : > { %s841_s12 = scalar_lea.hbm %s1136_s15, 128  ;;  %s845_s26 = scalar_lea.hbm %s1185_s5, 256 }
 0x222   : > { %p842_p13 = scmp.ne.s32.totalorder %s1136_s15, %s841_s12  ;;  %p846_p4 = scmp.lt.u32.totalorder %s1136_s15, %s1185_s5 }
 0x223   : > { %p847_p5 = scmp.lt.u32.totalorder %s845_s26, %s841_s12  ;;  %p849_p11 = scmp.lt.u32.totalorder %s841_s12, %s1136_s15 }
 0x224   : > { %p843_p6 = pnand %p842_p13, %p1199_p0 }
 0x225   : > { %p848_p8 = por %p847_p5, %p846_p4 }
 0x226   : > { %p844_p10 = pneg %p843_p6 }
 0x227   : > { %p850_p1 = por %p849_p11, %p848_p8 }
 0x229   : > { %p851_p3 = pnand %p850_p1, %p844_p10 }
 0x22b   : > { %854 = shalt.err (!%p851_p3)
}
 0x22c   : > { %679 = dma.vmem_to_hbm [thread:$0]  (%p1199_p0), %s1138_s7, 128, %s1136_s15, %s450_s16  }
 0x22d PF: > { %s475_s11 = sand.u32 1, %s885_s18   ;;  %p1200_p7 = scmp.ne.s32.totalorder %s1190_s25, 0 }
 0x22e   : > { %p1201_p9 = scmp.ge.s32.totalorder %s897_s21, 2  ;;  %s476_s28 = scalar_lea.sflag [#allocation4], %s475_s11 }
 0x230   : > { %p693_p12 = pnand %p1201_p9, %p1200_p7 }
 0x232   : > { %880 = dma.done.wait (!%p693_p12), %s476_s28, 128  }
 0x233   : > { %882 = vsyncadd (!%p693_p12), %s476_s28, 4294967168  ;;  %p19_p2 = scmp.ge.s32.totalorder %s1048_s14, 4   ;;  %s1202_s18 = smov %s889_s19 }
 0x234   : > { %s1203_s19 = smov %s893_s20  ;;  %s1204_s20 = smov %s1064_s27 }
 0x235   : > { %s1205_s21 = smov %s1048_s14  ;;  %21 = sbr.rel (!%p19_p2) target bundleno = 6 (0x6), region = 93 }
 0x23c   :  { %481 = vsyncpa [#allocation3], 1 }
 0x23d   :  { %483 = vsyncpa [#allocation3 + $0x1], 1 }
 0x23e   :  { %484 = vsyncpa [#allocation6], 1 }
 0x23f   :  { %485 = vsyncpa [#allocation4], 1 }
 0x240   :  { %487 = vsyncpa [#allocation4 + $0x1], 1 }

</bundles_post_ra>
